<compile_context>
chip_gen: v6e
topology: v6e:2x2x1
jax: 0.10.0
libtpu: 0.0.40
codegen_flags: <defaults>
</compile_context>

<pallas_src>
import functools
import math

import jax
import jax.numpy as jnp
import numpy as np
from jax.experimental import pallas as pl
from jax.experimental.pallas import tpu as pltpu

K = 3       # temporal kernel size of TimeBlock
LANE = 128  # TPU lane width; intermediate/output lane dims padded to this


def _round_up(x, m):
    return (x + m - 1) // m * m


# ---------------------------------------------------------------------------
# Fused Pallas kernel (Bt batch elements per grid step)
# ---------------------------------------------------------------------------
def _fused_stgcn_kernel(x_ref, a_ref, wA_ref, bA_ref, th_ref, wB_ref, bB_ref,
                        o_ref, *, bt, n, p1, p1s, p2, cdt):
    """Whole STGCN block for `bt` batch elements, fully VMEM/vreg resident.

    x_ref:  (bt*n, T*Cin)   node-major rows, time*feature on lanes
    a_ref:  (bt, n, n)      per-batch adjacency
    wA_ref: (T*Cin, 3*p1)   merged+banded TimeBlock1 weights (3 branches on lanes)
    bA_ref: (1, 3*p1)       f32 biases (time-tiled, zero in the lane padding)
    th_ref: (p1, p1s)       kron(I_T1, Theta1), zero-padded
    wB_ref: (p1s, 3*p2)     merged+banded TimeBlock2 weights
    bB_ref: (1, 3*p2)
    o_ref:  (bt*n, p2)      lane-dense padded output (padding sliced off outside)
    """
    x = x_ref[...].astype(cdt)

    # ---- TimeBlock 1: one MXU GEMM, branches recovered by 128-aligned slices.
    cA = jnp.dot(x, wA_ref[...], preferred_element_type=jnp.float32) + bA_ref[...]
    t1 = jnp.maximum(
        cA[:, :p1] + jax.nn.sigmoid(cA[:, p1:2 * p1]) + cA[:, 2 * p1:],
        0.0).astype(cdt)

    # ---- Theta1 before the graph conv (reassociation: A @ (t1 @ Theta)) -----
    tmp = jnp.dot(t1, th_ref[...], preferred_element_type=jnp.float32).astype(cdt)

    # ---- per-batch adjacency matmul (the only non-shared-weight GEMM) -------
    parts = []
    for b in range(bt):
        a_b = a_ref[b].astype(cdt)                      # (n, n)
        t_b = tmp[b * n:(b + 1) * n, :]                 # static sublane slice
        parts.append(jnp.dot(a_b, t_b, preferred_element_type=jnp.float32))
    lfs = parts[0] if bt == 1 else jnp.concatenate(parts, axis=0)
    t2 = jnp.tanh(lfs).astype(cdt)                      # (bt*n, p1s), padding == 0

    # ---- TimeBlock 2: one MXU GEMM ------------------------------------------
    cB = jnp.dot(t2, wB_ref[...], preferred_element_type=jnp.float32) + bB_ref[...]
    t3 = jnp.maximum(
        cB[:, :p2] + jax.nn.sigmoid(cB[:, p2:2 * p2]) + cB[:, 2 * p2:],
        0.0)
    o_ref[...] = t3.astype(o_ref.dtype)


# ---------------------------------------------------------------------------
# One-time, host-side weight repacking (kept out of the jitted hot path)
# ---------------------------------------------------------------------------
def _pack_timeblock(ws, bs, *, t_in, row_pad, col_pad_each, compute_dtype):
    """Fold the three (1,K) temporal convs of one TimeBlock into a single banded
    GEMM weight (row_pad, 3*col_pad_each) + bias (1, 3*col_pad_each):

        band[(t+k)*Cin + ci, br*col_pad + t*Cout + co] = w_br[k, ci, co]

    so x2d @ band computes all three valid temporal convs at once; each branch
    is zero-padded on lanes to a multiple of 128 (lane-dense slices in-kernel).
    """
    k_sz, cin, cout = ws[0].shape
    t_out = t_in - k_sz + 1
    assert row_pad >= t_in * cin
    w_cols, b_cols = [], []
    for w, b in zip(ws, bs):
        wnp = np.asarray(w, np.float32)
        band = np.zeros((row_pad, col_pad_each), np.float32)
        for t in range(t_out):
            for k in range(k_sz):
                band[(t + k) * cin:(t + k + 1) * cin,
                     t * cout:(t + 1) * cout] = wnp[k]
        w_cols.append(band)
        bias = np.zeros((1, col_pad_each), np.float32)
        bias[0, :t_out * cout] = np.tile(np.asarray(b, np.float32).reshape(-1), t_out)
        b_cols.append(bias)
    w_merged = np.concatenate(w_cols, axis=1)
    b_merged = np.concatenate(b_cols, axis=1)
    # Bias stays f32: it is added to the f32 MXU accumulator on the VPU.
    return jnp.asarray(w_merged, compute_dtype), jnp.asarray(b_merged, jnp.float32)


def _pack_theta(theta, t1, *, row_pad, col_pad, compute_dtype):
    """kron(I_{T1}, Theta1), zero-padded to (row_pad, col_pad); the zero rows
    kill the junk in the padded lanes of the preceding TimeBlock output."""
    th = np.asarray(theta, np.float32)
    cout, s = th.shape
    big = np.zeros((row_pad, col_pad), np.float32)
    for t in range(t1):
        big[t * cout:(t + 1) * cout, t * s:(t + 1) * s] = th
    return jnp.asarray(big, compute_dtype)


def pack_stgcn_params(p, num_timesteps, *, compute_dtype=jnp.bfloat16, lane=LANE):
    """Pack PyTorch-layout weights into lane-dense GEMM form. Call ONCE."""
    T = int(num_timesteps)
    k_sz, Cin, Cout = p['w1a'].shape
    S = p['theta'].shape[1]
    T1 = T - (k_sz - 1)
    T2 = T1 - (k_sz - 1)
    P1 = _round_up(T1 * Cout, lane)
    P1s = _round_up(T1 * S, lane)
    P2 = _round_up(T2 * Cout, lane)

    wA, bA = _pack_timeblock((p['w1a'], p['w2a'], p['w3a']),
                             (p['b1a'], p['b2a'], p['b3a']),
                             t_in=T, row_pad=T * Cin, col_pad_each=P1,
                             compute_dtype=compute_dtype)
    theta = _pack_theta(p['theta'], T1, row_pad=P1, col_pad=P1s,
                        compute_dtype=compute_dtype)
    wB, bB = _pack_timeblock((p['w1b'], p['w2b'], p['w3b']),
                             (p['b1b'], p['b2b'], p['b3b']),
                             t_in=T1, row_pad=P1s, col_pad_each=P2,
                             compute_dtype=compute_dtype)

    weights = dict(wA=wA, bA=bA, theta=theta, wB=wB, bB=bB)
    dims = dict(T=T, T1=T1, T2=T2, Cin=Cin, Cout=Cout, S=S,
                P1=P1, P1s=P1s, P2=P2)
    return weights, dims


# ---------------------------------------------------------------------------
# Wrapper
# ---------------------------------------------------------------------------
def _const_spec(a):
    nd = a.ndim
    return pl.BlockSpec(a.shape, lambda g, _nd=nd: (0,) * _nd)


def _choose_block_b(batch, n_nodes, target_rows=512):
    """Pick Bt (batch elements per grid step): divide B, keep Bt*N on sublanes
    reasonably large, keep >= 2 grid steps (v7x dual-TC), prefer even grids."""
    cands = []
    for bt in range(1, batch + 1):
        if batch % bt:
            continue
        if bt * n_nodes > max(target_rows, n_nodes):
            continue
        if (bt * n_nodes) % 8 and bt * n_nodes != batch * n_nodes:
            continue                       # (8,128) sublane constraint
        if batch >= 2 and batch // bt < 2:
            continue                       # never collapse to a 1-long grid
        cands.append(bt)
    if not cands:
        return batch
    even = [bt for bt in cands if (batch // bt) % 2 == 0]
    return max(even) if even else max(cands)


def batch_a_stgcn_block(X, A_hat, weights, *, dims, block_b=None):
    """Forward pass of BatchA_STGCNBlock.

    X: (B, N, T, in_channels), A_hat: (B, N, N)
    returns (B, N, T - 2*(K-1), out_channels)
    """
    B, N, T, Cin = X.shape
    assert T == dims['T'] and Cin == dims['Cin'], "params packed for other shape"
    T2, Cout = dims['T2'], dims['Cout']
    P1, P1s, P2 = dims['P1'], dims['P1s'], dims['P2']
    cdt = weights['wA'].dtype

    Bt = _choose_block_b(B, N) if block_b is None else block_b
    assert B % Bt == 0
    grid = (B // Bt,)

    x2d = X.reshape(B * N, T * Cin)        # trailing-dim merge, layout no-op

    # ---- advisory cost estimate + explicit VMEM budget -----------------------
    w_list = (weights['wA'], weights['bA'], weights['theta'],
              weights['wB'], weights['bB'])
    w_bytes = sum(int(w.size) * w.dtype.itemsize for w in w_list)
    flops = 2 * B * N * (T * Cin * 3 * P1 + P1 * P1s + N * P1s + P1s * 3 * P2)
    trans = B * N * (P1 + P1s + P2)
    bytes_accessed = (int(X.size) * X.dtype.itemsize
                      + int(A_hat.size) * A_hat.dtype.itemsize
                      + w_bytes + B * N * P2 * X.dtype.itemsize)
    cost = pl.CostEstimate(flops=flops, transcendentals=trans,
                           bytes_accessed=bytes_accessed)

    io_block = Bt * N * (T * Cin + N + P2) * X.dtype.itemsize
    temps = Bt * N * (4 * P1 + 3 * P1s + 4 * P2) * 4
    need = 2 * io_block + 2 * w_bytes + temps
    vmem_limit = int(min(64 * 2 ** 20, max(32 * 2 ** 20, 2 * need)))

    out = pl.pallas_call(
        functools.partial(_fused_stgcn_kernel, bt=Bt, n=N,
                          p1=P1, p1s=P1s, p2=P2, cdt=cdt),
        out_shape=jax.ShapeDtypeStruct((B * N, P2), X.dtype),
        grid=grid,
        in_specs=[pl.BlockSpec((Bt * N, T * Cin), lambda g: (g, 0)),
                  pl.BlockSpec((Bt, N, N), lambda g: (g, 0, 0)),
                  _const_spec(weights['wA']), _const_spec(weights['bA']),
                  _const_spec(weights['theta']),
                  _const_spec(weights['wB']), _const_spec(weights['bB'])],
        out_specs=pl.BlockSpec((Bt * N, P2), lambda g: (g, 0)),
        compiler_params=pltpu.CompilerParams(
            dimension_semantics=("parallel",),
            vmem_limit_bytes=vmem_limit),
        cost_estimate=cost,
    )(x2d, A_hat, weights['wA'], weights['bA'], weights['theta'],
      weights['wB'], weights['bB'])

    return out[:, :T2 * Cout].reshape(B, N, T2, Cout)


# ---------------------------------------------------------------------------
# Pure-JAX reference (verification only)
# ---------------------------------------------------------------------------
def timeblock_ref(x, w1, b1, w2, b2, w3, b3):
    B, N, T, _ = x.shape
    Tout = T - K + 1

    def conv(w, b):
        acc = jnp.zeros((B, N, Tout, w.shape[-1]), jnp.float32)
        for k in range(K):
            acc = acc + jnp.einsum('bntc,cd->bntd', x[:, :, k:k + Tout, :], w[k])
        return acc + b[0]

    return jax.nn.relu(conv(w1, b1) + jax.nn.sigmoid(conv(w2, b2)) + conv(w3, b3))


def ref_forward(X, A_hat, p):
    t = timeblock_ref(X, p['w1a'], p['b1a'], p['w2a'], p['b2a'], p['w3a'], p['b3a'])
    lfs = jnp.einsum('bij,bjtc->bitc', A_hat, t)
    t2 = jnp.tanh(jnp.einsum('bntc,cs->bnts', lfs, p['theta']))
    return timeblock_ref(t2, p['w1b'], p['b1b'], p['w2b'], p['b2b'], p['w3b'], p['b3b'])


# ---------------------------------------------------------------------------
if __name__ == "__main__":
    key = jax.random.PRNGKey(0)
    B, N, T = 2, 8, 12
    in_channels, out_channels, spatial_channels = 4, 8, 16

    keys = jax.random.split(key, 16)

    def conv_wb(kw, kb, cin, cout):
        # PyTorch Conv2d default init: U(-1/sqrt(fan_in), 1/sqrt(fan_in)), fan_in=cin*K
        bound = 1.0 / math.sqrt(cin * K)
        w = jax.random.uniform(kw, (K, cin, cout), jnp.float32, -bound, bound)
        b = jax.random.uniform(kb, (1, cout), jnp.float32, -bound, bound)
        return w, b

    p = {}
    p['w1a'], p['b1a'] = conv_wb(keys[0], keys[1], in_channels, out_channels)
    p['w2a'], p['b2a'] = conv_wb(keys[2], keys[3], in_channels, out_channels)
    p['w3a'], p['b3a'] = conv_wb(keys[4], keys[5], in_channels, out_channels)
    stdv = 1.0 / math.sqrt(spatial_channels)
    p['theta'] = jax.random.uniform(keys[6], (out_channels, spatial_channels),
                                    jnp.float32, -stdv, stdv)
    p['w1b'], p['b1b'] = conv_wb(keys[7], keys[8], spatial_channels, out_channels)
    p['w2b'], p['b2b'] = conv_wb(keys[9], keys[10], spatial_channels, out_channels)
    p['w3b'], p['b3b'] = conv_wb(keys[11], keys[12], spatial_channels, out_channels)

    X = jax.random.normal(keys[13], (B, N, T, in_channels), jnp.float32)
    A_raw = jax.random.uniform(keys[14], (B, N, N), jnp.float32)
    A_hat = A_raw / jnp.sum(A_raw, axis=-1, keepdims=True)   # row-normalized adjacency

    ref = jax.block_until_ready(ref_forward(X, A_hat, p))
    T_out = T - 2 * (K - 1)

    # ---- exact f32 MXU path: tight check (covers the matmul reassociation) ---
    w32, dims32 = pack_stgcn_params(p, T, compute_dtype=jnp.float32)
    fwd32 = jax.jit(functools.partial(batch_a_stgcn_block, dims=dims32))
    out32 = jax.block_until_ready(fwd32(X, A_hat, w32))
    assert out32.shape == (B, N, T_out, out_channels), out32.shape
    np.testing.assert_allclose(np.asarray(out32), np.asarray(ref),
                               rtol=1e-4, atol=1e-4)

    # ---- production bf16-operand / f32-accumulate path: loose check ----------
    w16, dims16 = pack_stgcn_params(p, T)                    # default bf16
    fwd16 = jax.jit(functools.partial(batch_a_stgcn_block, dims=dims16))
    out16 = jax.block_until_ready(fwd16(X, A_hat, w16))
    assert out16.shape == (B, N, T_out, out_channels), out16.shape
    np.testing.assert_allclose(np.asarray(out16), np.asarray(ref),
                               rtol=1e-1, atol=5e-2)

    print("KERNEL_OK")
</pallas_src>

<mosaic_0001>
module attributes {stable_mosaic.version = 11 : i64} {
  func.func @_fused_stgcn_kernel(%arg0: i32, %arg1: memref<8x48xf32, #tpu.memory_space<vmem>>, %arg2: memref<1x8x8xf32, #tpu.memory_space<vmem>>, %arg3: memref<48x384xf32, #tpu.memory_space<vmem>>, %arg4: memref<1x384xf32, #tpu.memory_space<vmem>>, %arg5: memref<128x256xf32, #tpu.memory_space<vmem>>, %arg6: memref<256x384xf32, #tpu.memory_space<vmem>>, %arg7: memref<1x384xf32, #tpu.memory_space<vmem>>, %arg8: memref<8x128xf32, #tpu.memory_space<vmem>>) attributes {dimension_semantics = [#tpu.dimension_semantics<parallel>], iteration_bounds = array<i64: 2>, scalar_prefetch = 0 : i64, scratch_operands = 0 : i64, tpu.core_type = #tpu.core_type<tc>, window_params = [{transform_indices = @transform_0, window_bounds = array<i64: 8, 48>}, {transform_indices = @transform_1, window_bounds = array<i64: 1, 8, 8>}, {pipeline_mode = #tpu.pipeline_mode<synchronous>, transform_indices = @transform_2, window_bounds = array<i64: 48, 384>}, {pipeline_mode = #tpu.pipeline_mode<synchronous>, transform_indices = @transform_3, window_bounds = array<i64: 1, 384>}, {pipeline_mode = #tpu.pipeline_mode<synchronous>, transform_indices = @transform_4, window_bounds = array<i64: 128, 256>}, {pipeline_mode = #tpu.pipeline_mode<synchronous>, transform_indices = @transform_5, window_bounds = array<i64: 256, 384>}, {pipeline_mode = #tpu.pipeline_mode<synchronous>, transform_indices = @transform_6, window_bounds = array<i64: 1, 384>}, {transform_indices = @transform_7, window_bounds = array<i64: 8, 128>}]} {
    %c0 = arith.constant 0 : index
    %c0_0 = arith.constant 0 : index
    %0 = vector.load %arg1[%c0, %c0_0] : memref<8x48xf32, #tpu.memory_space<vmem>>, vector<8x48xf32>
    %c0_1 = arith.constant 0 : index
    %c0_2 = arith.constant 0 : index
    %1 = vector.load %arg3[%c0_1, %c0_2] : memref<48x384xf32, #tpu.memory_space<vmem>>, vector<48x384xf32>
    %cst = arith.constant dense<0.000000e+00> : vector<8x384xf32>
    %2 = tpu.matmul %0, %1, %cst {dimension_numbers = #tpu.dot_dimension_numbers<[1], [0], [0], [1], [0, 0, 1, 1], [], []>} : vector<8x48xf32>, vector<48x384xf32>, vector<8x384xf32> -> vector<8x384xf32>
    %c0_3 = arith.constant 0 : index
    %c0_4 = arith.constant 0 : index
    %3 = vector.load %arg4[%c0_3, %c0_4] : memref<1x384xf32, #tpu.memory_space<vmem>>, vector<1x384xf32>
    %4 = vector.broadcast %3 : vector<1x384xf32> to vector<8x384xf32>
    %5 = arith.addf %2, %4 : vector<8x384xf32>
    %6 = vector.extract_strided_slice %5 {offsets = [0, 0], sizes = [8, 128], strides = [1, 1]} : vector<8x384xf32> to vector<8x128xf32>
    %7 = vector.extract_strided_slice %5 {offsets = [0, 128], sizes = [8, 128], strides = [1, 1]} : vector<8x384xf32> to vector<8x128xf32>
    %8 = arith.negf %7 : vector<8x128xf32>
    %9 = math.exp %8 : vector<8x128xf32>
    %cst_5 = arith.constant 1.000000e+00 : f32
    %10 = vector.broadcast %cst_5 : f32 to vector<8x128xf32>
    %11 = arith.addf %10, %9 : vector<8x128xf32>
    %12 = arith.divf %10, %11 : vector<8x128xf32>
    %13 = arith.addf %6, %12 : vector<8x128xf32>
    %14 = vector.extract_strided_slice %5 {offsets = [0, 256], sizes = [8, 128], strides = [1, 1]} : vector<8x384xf32> to vector<8x128xf32>
    %15 = arith.addf %13, %14 : vector<8x128xf32>
    %cst_6 = arith.constant 0.000000e+00 : f32
    %16 = vector.broadcast %cst_6 : f32 to vector<8x128xf32>
    %17 = arith.maximumf %15, %16 : vector<8x128xf32>
    %c0_7 = arith.constant 0 : index
    %c0_8 = arith.constant 0 : index
    %18 = vector.load %arg5[%c0_7, %c0_8] : memref<128x256xf32, #tpu.memory_space<vmem>>, vector<128x256xf32>
    %cst_9 = arith.constant dense<0.000000e+00> : vector<8x256xf32>
    %19 = tpu.matmul %17, %18, %cst_9 {dimension_numbers = #tpu.dot_dimension_numbers<[1], [0], [0], [1], [0, 0, 1, 1], [], []>} : vector<8x128xf32>, vector<128x256xf32>, vector<8x256xf32> -> vector<8x256xf32>
    %c0_10 = arith.constant 0 : index
    %c0_11 = arith.constant 0 : index
    %c0_12 = arith.constant 0 : index
    %20 = vector.load %arg2[%c0_10, %c0_11, %c0_12] : memref<1x8x8xf32, #tpu.memory_space<vmem>>, vector<1x8x8xf32>
    %21 = vector.shape_cast %20 : vector<1x8x8xf32> to vector<8x8xf32>
    %cst_13 = arith.constant dense<0.000000e+00> : vector<8x256xf32>
    %22 = tpu.matmul %21, %19, %cst_13 {dimension_numbers = #tpu.dot_dimension_numbers<[1], [0], [0], [1], [0, 0, 1, 1], [], []>} : vector<8x8xf32>, vector<8x256xf32>, vector<8x256xf32> -> vector<8x256xf32>
    %23 = math.tanh %22 : vector<8x256xf32>
    %c0_14 = arith.constant 0 : index
    %c0_15 = arith.constant 0 : index
    %24 = vector.load %arg6[%c0_14, %c0_15] : memref<256x384xf32, #tpu.memory_space<vmem>>, vector<256x384xf32>
    %cst_16 = arith.constant dense<0.000000e+00> : vector<8x384xf32>
    %25 = tpu.matmul %23, %24, %cst_16 {dimension_numbers = #tpu.dot_dimension_numbers<[1], [0], [0], [1], [0, 0, 1, 1], [], []>} : vector<8x256xf32>, vector<256x384xf32>, vector<8x384xf32> -> vector<8x384xf32>
    %c0_17 = arith.constant 0 : index
    %c0_18 = arith.constant 0 : index
    %26 = vector.load %arg7[%c0_17, %c0_18] : memref<1x384xf32, #tpu.memory_space<vmem>>, vector<1x384xf32>
    %27 = vector.broadcast %26 : vector<1x384xf32> to vector<8x384xf32>
    %28 = arith.addf %25, %27 : vector<8x384xf32>
    %29 = vector.extract_strided_slice %28 {offsets = [0, 0], sizes = [8, 128], strides = [1, 1]} : vector<8x384xf32> to vector<8x128xf32>
    %30 = vector.extract_strided_slice %28 {offsets = [0, 128], sizes = [8, 128], strides = [1, 1]} : vector<8x384xf32> to vector<8x128xf32>
    %31 = arith.negf %30 : vector<8x128xf32>
    %32 = math.exp %31 : vector<8x128xf32>
    %cst_19 = arith.constant 1.000000e+00 : f32
    %33 = vector.broadcast %cst_19 : f32 to vector<8x128xf32>
    %34 = arith.addf %33, %32 : vector<8x128xf32>
    %35 = arith.divf %33, %34 : vector<8x128xf32>
    %36 = arith.addf %29, %35 : vector<8x128xf32>
    %37 = vector.extract_strided_slice %28 {offsets = [0, 256], sizes = [8, 128], strides = [1, 1]} : vector<8x384xf32> to vector<8x128xf32>
    %38 = arith.addf %36, %37 : vector<8x128xf32>
    %cst_20 = arith.constant 0.000000e+00 : f32
    %39 = vector.broadcast %cst_20 : f32 to vector<8x128xf32>
    %40 = arith.maximumf %38, %39 : vector<8x128xf32>
    %c0_21 = arith.constant 0 : index
    %c0_22 = arith.constant 0 : index
    %41 = vector.load %arg8[%c0_21, %c0_22] : memref<8x128xf32, #tpu.memory_space<vmem>>, vector<8x128xf32>
    tpu.vector_store %arg8[%c0_21, %c0_22], %40 {strides = array<i32>} : memref<8x128xf32, #tpu.memory_space<vmem>>, vector<8x128xf32>,
    return
  }
  func.func @transform_0(%arg0: i32) -> (i32, i32) {
    %c0_i32 = arith.constant 0 : i32
    %c0_i32_0 = arith.constant 0 : i32
    return %arg0, %c0_i32 : i32, i32
  }
  func.func @transform_1(%arg0: i32) -> (i32, i32, i32) {
    %c0_i32 = arith.constant 0 : i32
    %c0_i32_0 = arith.constant 0 : i32
    %c0_i32_1 = arith.constant 0 : i32
    return %arg0, %c0_i32, %c0_i32_0 : i32, i32, i32
  }
  func.func @transform_2(%arg0: i32) -> (i32, i32) {
    %c0_i32 = arith.constant 0 : i32
    %c0_i32_0 = arith.constant 0 : i32
    %c0_i32_1 = arith.constant 0 : i32
    return %c0_i32, %c0_i32_0 : i32, i32
  }
  func.func @transform_3(%arg0: i32) -> (i32, i32) {
    %c0_i32 = arith.constant 0 : i32
    %c0_i32_0 = arith.constant 0 : i32
    %c0_i32_1 = arith.constant 0 : i32
    return %c0_i32, %c0_i32_0 : i32, i32
  }
  func.func @transform_4(%arg0: i32) -> (i32, i32) {
    %c0_i32 = arith.constant 0 : i32
    %c0_i32_0 = arith.constant 0 : i32
    %c0_i32_1 = arith.constant 0 : i32
    return %c0_i32, %c0_i32_0 : i32, i32
  }
  func.func @transform_5(%arg0: i32) -> (i32, i32) {
    %c0_i32 = arith.constant 0 : i32
    %c0_i32_0 = arith.constant 0 : i32
    %c0_i32_1 = arith.constant 0 : i32
    return %c0_i32, %c0_i32_0 : i32, i32
  }
  func.func @transform_6(%arg0: i32) -> (i32, i32) {
    %c0_i32 = arith.constant 0 : i32
    %c0_i32_0 = arith.constant 0 : i32
    %c0_i32_1 = arith.constant 0 : i32
    return %c0_i32, %c0_i32_0 : i32, i32
  }
  func.func @transform_7(%arg0: i32) -> (i32, i32) {
    %c0_i32 = arith.constant 0 : i32
    %c0_i32_0 = arith.constant 0 : i32
    return %arg0, %c0_i32 : i32, i32
  }
}

</mosaic_0001>

<bundles_post_ra>
// kernel: batch_a_stgcn_block.1
= control target key start
LH: loop header
LB: loop body
LE: loop exit
PB: predicated region body
PF: predicated region fallthrough
CT: control target
= control target key end

     0   :  { %12 = vsyncpa [#allocation3], 0  ;;  %s1467_s0 = inlined_call_operand.vmem [shape: f32[16,48], index: 0, kind: input, shape index: {}]   ;;  %s1468_s1 = inlined_call_operand.vmem [shape: f32[2,8,8], index: 1, kind: input, shape index: {}]   ;;  %s1469_s2 = inlined_call_operand.hbm [shape: f32[48,384], index: 2, kind: input, shape index: {}]   ;;  %s1470_s3 = inlined_call_operand.vmem [shape: f32[1,384], index: 3, kind: input, shape index: {}]   ;;  %s1471_s4 = inlined_call_operand.vmem [shape: f32[128,256], index: 4, kind: input, shape index: {}]   ;;  %s1472_s5 = inlined_call_operand.hbm [shape: f32[256,384], index: 5, kind: input, shape index: {}]   ;;  %s1473_s6 = inlined_call_operand.vmem [shape: f32[1,384], index: 6, kind: input, shape index: {}]   ;;  %s1474_s7 = inlined_call_operand.vmem [shape: f32[16,128], index: 7, kind: output, shape index: {}]  }
   0x1   :  { %13 = vsyncpa [#allocation5], 0  ;;  %s1278_s24 = smov 0  }
   0x2 LB: > { %s1284_s25 = sadd.s32 4294967295, %s1230_s24   ;;  %p1045_p0 = scmp.ge.s32.totalorder %s1230_s24, 1  ;;  %s1230_s24 = sphi %s1278_s24, %s19_s24  }
   0x3   : > { %p207_p1 = scmp.lt.s32.totalorder %s1230_s24, 3  ;;  %s1232_s26 = smov [#allocation2]  }
   0x4   : > { %s219_s27 = sshll.u32 %s1232_s26, 4  ;;  %p1134_p3 = scmp.eq.s32.totalorder %s1284_s25, 0  ;;  %s220_s27 = int_to_ptr.vmem [resolvable:$true] %s219_s27 }
   0x5   : > { %p1288_p2 = pnand %p1045_p0, %p207_p1  ;;  %s1233_s29 = smov [#allocation4]  }
   0x6   : > { %s238_s30 = sshll.u32 %s1233_s29, 4  ;;  %s1175_s9 = scalar_lea.vmem %s220_s27, 2304  ;;  %s239_s30 = int_to_ptr.vmem [resolvable:$true] %s238_s30 }
   0x7   : > { %p1127_p4 = pneg %p1288_p2  ;;  %p1176_p7 = scmp.ne.s32.totalorder %s220_s27, %s1175_s9 }
   0x8   : > { %p1183_p10 = scmp.lt.s32.totalorder %s220_s27, %s220_s27  ;;  %p1184_p11 = scmp.lt.s32.totalorder %s1175_s9, %s1175_s9 }
   0x9   : > { %p1297_p5 = pnand %p1134_p3, %p1127_p4 }
   0xa   : > { %p1185_p12 = por %p1184_p11, %p1183_p10 }
   0xb   : > { %p1166_p6 = pneg %p1297_p5 }
   0xd   : > { %p1178_p8 = pnand %p1176_p7, %p1166_p6 }
   0xf   : > { %p1179_p9 = pneg %p1178_p8 }
  0x11   : > { %p1186_p13 = pnand %p1185_p12, %p1179_p9 }
  0x13   : > { %1189 = shalt.err (!%p1186_p13)
}
  0x14   : > { %s1234_s10 = smov 384   ;;  %s1235_s11 = smov 24  }
  0x15   : > { %1130 = dma.hbm_to_vmem [thread:$0]  (!%p1297_p5), %s1469_s2, 2304, %s220_s27, [#allocation3], %s1234_s10, %s1234_s10, %s1235_s11  }
  0x16   : > { %s1201_s14 = scalar_lea.vmem %s239_s30, 12288  ;;  %p1209_p7 = scmp.lt.s32.totalorder %s239_s30, %s239_s30 }
  0x17   : > { %p1202_p0 = scmp.ne.s32.totalorder %s239_s30, %s1201_s14  ;;  %p1210_p8 = scmp.lt.s32.totalorder %s1201_s14, %s1201_s14 }
  0x19   : > { %p1204_p1 = pnand %p1202_p0, %p1166_p6  ;;  %p1211_p10 = por %p1210_p8, %p1209_p7 }
  0x1b   : > { %p1205_p4 = pneg %p1204_p1 }
  0x1d   : > { %p1212_p9 = pnand %p1211_p10, %p1205_p4 }
  0x1f   : > { %1215 = shalt.err (!%p1212_p9)
}
  0x20   : > { %1133 = dma.hbm_to_vmem [thread:$0]  (!%p1297_p5), %s1472_s5, 12288, %s239_s30, [#allocation5], %s1234_s10, %s1234_s10, %s1235_s11  }
  0x21   : > { %271 = sbr.rel (%p1288_p2) target bundleno = 933 (0x3a5), region = 48 }
  0x26   : > { %1221 = dma.done.wait (%p1134_p3), [#allocation3], 2304  }
  0x27   : > { %1223 = vsyncadd (%p1134_p3), [#allocation3], 4294964992 }
  0x28   : > { %1225 = dma.done.wait (%p1134_p3), [#allocation5], 12288  }
  0x29   : > { %1227 = vsyncadd (%p1134_p3), [#allocation5], 4294955008  ;;  %v1236_v0 = vmov 0.0   ;;  %vm1237_vm0 = vmmov 0   ;;  %p309_p2 = scmp.lt.s32.totalorder %s1284_s25, 1  ;;  %v338_v1 = vld [vmem:[#allocation2 + $0x80] sm:$0xff]  ;;  %v342_v52 = vlaneseq }
  0x2a   : > { %425 = vmatprep.mubr.f32.mxu0 %v1236_v0  ;;  %1104 = vmatprep.subr.mxu1 %v1236_v0  ;;  %v337_v2 = vld [vmem:[#allocation2 + $0x78] sm:$0xff]  ;;  %v335_v3 = vld [vmem:[#allocation2 + $0x68] sm:$0xff]  ;;  %v334_v4 = vld [vmem:[#allocation2 + $0x60] sm:$0xff]  ;;  %vm357_vm1 = vcmask 392192   ;;  %vm615_vm2 = vcmask 64512  }
  0x2b   : > { %1116 = vmatprep.mubr.msk.f32.mxu1 %vm1237_vm0, %v1236_v0  ;;  %s1478_s25 = smov (!%p309_p2, %s1284_s25), 1  ;;  %381 = vmatprep.subr.mxu0 %v338_v1  ;;  %v332_v5 = vld [vmem:[#allocation2 + $0x50] sm:$0xff]  ;;  %v331_v6 = vld [vmem:[#allocation2 + $0x48] sm:$0xff]  ;;  %v329_v7 = vld [vmem:[#allocation2 + $0x38] sm:$0xff]  ;;  %v1433_v53 = vshrl.u32 %v342_v52, 7 }
  0x2c   : > { %382 = vmatpush1.msra.mxu0 %v337_v2  ;;  %s1331_s17 = sshll.u32 %s1478_s25, 3  ;;  %v339_v8 = vld [vmem:[#allocation2 + $0x88] sm:$0xff]  ;;  %v336_v9 = vld [vmem:[#allocation2 + $0x70] sm:$0xff]  ;;  %v326_v11 = vld [vmem:[#allocation2 + $0x20] sm:$0xff] }
  0x2d   : > { %383 = vmatprep.subr.mxu0 %v335_v3  ;;  %v328_v10 = vld [vmem:[#allocation2 + $0x30] sm:$0xff]  ;;  %1105 = vmatpush3.msra.mxu1 %v339_v8  ;;  %v333_v12 = vld [vmem:[#allocation2 + $0x58] sm:$0xff]  ;;  %s312_s20 = scalar_lea.vmem %s1467_s0, %s1331_s17  ;;  %v323_v14 = vld [vmem:[#allocation2 + $0x8] sm:$0xff]  ;;  %v348_v54 = vsub.s32 1, %v1433_v53  ;;  %v344_v1 = vsub.s32 0, %v1433_v53  ;;  %v352_v2 = vsub.s32 2, %v1433_v53  ;;  %s316_s27 = scalar_lea.vmem %s1468_s1, %s1331_s17 }
  0x2e   : > { %384 = vmatpush1.msra.mxu0 %v334_v4  ;;  %1106 = vmatprep.subr.mxu1 %v1236_v0  ;;  %v325_v13 = vld [vmem:[#allocation2 + $0x18] sm:$0xff]  ;;  %v330_v15 = vld [vmem:[#allocation2 + $0x40] sm:$0xff]  ;;  %v327_v18 = vld [vmem:[#allocation2 + $0x28] sm:$0xff]  ;;  %s320_s9 = scalar_lea.vmem %s1474_s7, %s1331_s17 }
  0x2f   : > { %385 = vmatprep.subr.mxu0 %v332_v5  ;;  %1107 = vmatpush3.msra.mxu1 %v336_v9  ;;  %v322_v16 = vld [vmem:[#allocation2] sm:$0xff]  ;;  %v324_v19 = vld [vmem:[#allocation2 + $0x10] sm:$0xff]  ;;  %v542_v20 = vld [vmem:[%s1471_s4 + $0xf8] sm:$0xff] }
  0x30   : > { %386 = vmatpush1.msra.mxu0 %v331_v6  ;;  %1108 = vmatprep.subr.mxu1 %v1236_v0  ;;  %v321_v17 = vld [vmem:[%s312_s20] sm:$0xff]  ;;  %v541_v21 = vld [vmem:[%s1471_s4 + $0xf0] sm:$0xff]  ;;  %v540_v22 = vld [vmem:[%s1471_s4 + $0xe8] sm:$0xff] }
  0x31   : > { %387 = vmatprep.subr.mxu0 %v329_v7  ;;  %1109 = vmatpush3.msra.mxu1 %v333_v12  ;;  %v539_v23 = vld [vmem:[%s1471_s4 + $0xe0] sm:$0xff]  ;;  %v538_v24 = vld [vmem:[%s1471_s4 + $0xd8] sm:$0xff]  ;;  %v537_v25 = vld [vmem:[%s1471_s4 + $0xd0] sm:$0xff] }
  0x32   : > { %388 = vmatpush1.msra.mxu0 %v328_v10  ;;  %1110 = vmatprep.subr.mxu1 %v1236_v0  ;;  %v536_v26 = vld [vmem:[%s1471_s4 + $0xc8] sm:$0xff]  ;;  %v535_v27 = vld [vmem:[%s1471_s4 + $0xc0] sm:$0xff]  ;;  %v534_v28 = vld [vmem:[%s1471_s4 + $0xb8] sm:$0xff] }
  0x33   : > { %389 = vmatprep.subr.mxu0 %v326_v11  ;;  %1111 = vmatpush3.msra.mxu1 %v330_v15  ;;  %v533_v29 = vld [vmem:[%s1471_s4 + $0xb0] sm:$0xff]  ;;  %v532_v30 = vld [vmem:[%s1471_s4 + $0xa8] sm:$0xff]  ;;  %v531_v31 = vld [vmem:[%s1471_s4 + $0xa0] sm:$0xff] }
  0x34   : > { %390 = vmatpush1.msra.mxu0 %v325_v13  ;;  %1112 = vmatprep.subr.mxu1 %v1236_v0  ;;  %v530_v32 = vld [vmem:[%s1471_s4 + $0x98] sm:$0xff]  ;;  %v529_v33 = vld [vmem:[%s1471_s4 + $0x90] sm:$0xff]  ;;  %v528_v34 = vld [vmem:[%s1471_s4 + $0x88] sm:$0xff] }
  0x35   : > { %391 = vmatprep.subr.mxu0 %v323_v14  ;;  %1113 = vmatpush3.msra.mxu1 %v327_v18  ;;  %v527_v35 = vld [vmem:[%s1471_s4 + $0x80] sm:$0xff]  ;;  %v526_v36 = vld [vmem:[%s1471_s4 + $0x78] sm:$0xff]  ;;  %v525_v37 = vld [vmem:[%s1471_s4 + $0x70] sm:$0xff] }
  0x36   : > { %392 = vmatpush1.msra.mxu0 %v322_v16  ;;  %1114 = vmatprep.subr.mxu1 %v1236_v0  ;;  %v524_v38 = vld [vmem:[%s1471_s4 + $0x68] sm:$0xff]  ;;  %v523_v39 = vld [vmem:[%s1471_s4 + $0x60] sm:$0xff]  ;;  %v522_v40 = vld [vmem:[%s1471_s4 + $0x58] sm:$0xff] }
  0x37   : > { %1055 = vmatmul.mubr.msk.f32.vlgmr.msra.gmra.mxu0 %vm357_vm1, %v321_v17  ;;  %1115 = vmatpush3.msra.mxu1 %v324_v19  ;;  %v521_v41 = vld [vmem:[%s1471_s4 + $0x50] sm:$0xff]  ;;  %v520_v42 = vld [vmem:[%s1471_s4 + $0x48] sm:$0xff]  ;;  %v519_v43 = vld [vmem:[%s1471_s4 + $0x40] sm:$0xff] }
  0x38   : > { %607 = vmatprep.mubr.f32.mxu0 %v1236_v0  ;;  %1117 = vmatmul.mubr.msk.f32.vlgmr.msra.gmra.mxu1 %vm357_vm1, %v321_v17  ;;  %v518_v44 = vld [vmem:[%s1471_s4 + $0x38] sm:$0xff]  ;;  %v517_v45 = vld [vmem:[%s1471_s4 + $0x30] sm:$0xff]  ;;  %v516_v46 = vld [vmem:[%s1471_s4 + $0x28] sm:$0xff] }
  0x39   : > { %683 = vmatprep.mubr.f32.mxu1 %v1236_v0  ;;  %543 = vmatprep.subr.mxu0 %v542_v20  ;;  %v515_v47 = vld [vmem:[%s1471_s4 + $0x20] sm:$0xff]  ;;  %v514_v48 = vld [vmem:[%s1471_s4 + $0x18] sm:$0xff]  ;;  %v513_v49 = vld [vmem:[%s1471_s4 + $0x10] sm:$0xff] }
  0x3a   : > { %544 = vmatpush1.msra.mxu0 %v541_v21  ;;  %v512_v50 = vld [vmem:[%s1471_s4 + $0x8] sm:$0xff]  ;;  %v511_v51 = vld [vmem:[%s1471_s4] sm:$0xff]  ;;  %v784_v13 = vld [vmem:[#allocation4 + $0x2e0] sm:$0xff] }
  0x3b   : > { %545 = vmatprep.subr.mxu0 %v540_v22  ;;  %v340_v55 = vld [vmem:[%s1470_s3] sm:$0x7]  ;;  %v787_v11 = vld [vmem:[#allocation4 + $0x2f8] sm:$0xff]  ;;  %v736_v14 = vld [vmem:[#allocation4 + $0x160] sm:$0xff] }
  0x3c   : > { %546 = vmatpush1.msra.mxu0 %v539_v23  ;;  %v349_v56 = vrot.slane %v340_v55, %v348_v54  ;;  %v345_v3 = vrot.slane %v340_v55, %v344_v1  ;;  %v353_v4 = vrot.slane %v340_v55, %v352_v2  ;;  %v739_v12 = vld [vmem:[#allocation4 + $0x178] sm:$0xff]  ;;  %v781_v15 = vld [vmem:[#allocation4 + $0x2c8] sm:$0xff]  ;;  %v778_v17 = vld [vmem:[#allocation4 + $0x2b0] sm:$0xff] }
  0x3d   : > { %547 = vmatprep.subr.mxu0 %v538_v24  ;;  %v733_v16 = vld [vmem:[#allocation4 + $0x148] sm:$0xff]  ;;  %v730_v18 = vld [vmem:[#allocation4 + $0x130] sm:$0xff]  ;;  %v775_v19 = vld [vmem:[#allocation4 + $0x298] sm:$0xff] }
  0x3e   : > { %548 = vmatpush1.msra.mxu0 %v537_v25  ;;  %v727_v20 = vld [vmem:[#allocation4 + $0x118] sm:$0xff]  ;;  %v772_v21 = vld [vmem:[#allocation4 + $0x280] sm:$0xff]  ;;  %v769_v23 = vld [vmem:[#allocation4 + $0x268] sm:$0xff] }
  0x3f   : > { %549 = vmatprep.subr.mxu0 %v536_v26  ;;  %v724_v22 = vld [vmem:[#allocation4 + $0x100] sm:$0xff]  ;;  %v721_v24 = vld [vmem:[#allocation4 + $0xe8] sm:$0xff]  ;;  %v702_v52 = vld [vmem:[#allocation4 + $0x50] sm:$0xff] }
  0x40   : > { %550 = vmatpush1.msra.mxu0 %v535_v27  ;;  %v614_v27 = vld [vmem:[%s316_s27] sm:$0xff]  ;;  %v701_v55 = vld [vmem:[#allocation4 + $0x48] sm:$0xff] }
  0x41   : > { %551 = vmatprep.subr.mxu0 %v534_v28  ;;  %v738_v28 = vld [vmem:[#allocation4 + $0x170] sm:$0xff] }
  0x42   : > { %552 = vmatpush1.msra.mxu0 %v533_v29  ;;  %v737_v29 = vld [vmem:[#allocation4 + $0x168] sm:$0xff] }
  0x43   : > { %553 = vmatprep.subr.mxu0 %v532_v30  ;;  %v735_v30 = vld [vmem:[#allocation4 + $0x158] sm:$0xff] }
  0x44   : > { %554 = vmatpush1.msra.mxu0 %v531_v31  ;;  %v734_v31 = vld [vmem:[#allocation4 + $0x150] sm:$0xff] }
  0x45   : > { %555 = vmatprep.subr.mxu0 %v530_v32  ;;  %v732_v32 = vld [vmem:[#allocation4 + $0x140] sm:$0xff] }
  0x46   : > { %556 = vmatpush1.msra.mxu0 %v529_v33  ;;  %v731_v33 = vld [vmem:[#allocation4 + $0x138] sm:$0xff] }
  0x47   : > { %557 = vmatprep.subr.mxu0 %v528_v34  ;;  %v729_v34 = vld [vmem:[#allocation4 + $0x128] sm:$0xff] }
  0x48   : > { %558 = vmatpush1.msra.mxu0 %v527_v35  ;;  %v728_v35 = vld [vmem:[#allocation4 + $0x120] sm:$0xff] }
  0x49   : > { %559 = vmatprep.subr.mxu0 %v526_v36  ;;  %v726_v36 = vld [vmem:[#allocation4 + $0x110] sm:$0xff] }
  0x4a   : > { %560 = vmatpush1.msra.mxu0 %v525_v37  ;;  %v725_v37 = vld [vmem:[#allocation4 + $0x108] sm:$0xff] }
  0x4b   : > { %561 = vmatprep.subr.mxu0 %v524_v38  ;;  %v723_v38 = vld [vmem:[#allocation4 + $0xf8] sm:$0xff] }
  0x4c   : > { %562 = vmatpush1.msra.mxu0 %v523_v39  ;;  %v722_v39 = vld [vmem:[#allocation4 + $0xf0] sm:$0xff] }
  0x4d   : > { %563 = vmatprep.subr.mxu0 %v522_v40  ;;  %v720_v40 = vld [vmem:[#allocation4 + $0xe0] sm:$0xff] }
  0x4e   : > { %564 = vmatpush1.msra.mxu0 %v521_v41  ;;  %v719_v41 = vld [vmem:[#allocation4 + $0xd8] sm:$0xff] }
  0x4f   : > { %565 = vmatprep.subr.mxu0 %v520_v42  ;;  %v717_v42 = vld [vmem:[#allocation4 + $0xc8] sm:$0xff] }
  0x50   : > { %566 = vmatpush1.msra.mxu0 %v519_v43  ;;  %v716_v43 = vld [vmem:[#allocation4 + $0xc0] sm:$0xff] }
  0x51   : > { %567 = vmatprep.subr.mxu0 %v518_v44  ;;  %v714_v44 = vld [vmem:[#allocation4 + $0xb0] sm:$0xff] }
  0x52   : > { %568 = vmatpush1.msra.mxu0 %v517_v45  ;;  %v713_v45 = vld [vmem:[#allocation4 + $0xa8] sm:$0xff] }
  0x53   : > { %569 = vmatprep.subr.mxu0 %v516_v46  ;;  %v711_v46 = vld [vmem:[#allocation4 + $0x98] sm:$0xff] }
  0x54   : > { %570 = vmatpush1.msra.mxu0 %v515_v47  ;;  %v710_v47 = vld [vmem:[#allocation4 + $0x90] sm:$0xff] }
  0x55   : > { %571 = vmatprep.subr.mxu0 %v514_v48  ;;  %v708_v48 = vld [vmem:[#allocation4 + $0x80] sm:$0xff] }
  0x56   : > { %572 = vmatpush1.msra.mxu0 %v513_v49  ;;  %v707_v49 = vld [vmem:[#allocation4 + $0x78] sm:$0xff] }
  0x57   : > { %573 = vmatprep.subr.mxu0 %v512_v50  ;;  %v705_v50 = vld [vmem:[#allocation4 + $0x68] sm:$0xff] }
  0x58   : > { %574 = vmatpush1.msra.mxu0 %v511_v51  ;;  %v704_v51 = vld [vmem:[#allocation4 + $0x60] sm:$0xff] }
  0x59   : > { %1069 = vmatprep.subr.mxu0 %v787_v11  ;;  %v770_v11 = vld [vmem:[#allocation4 + $0x270] sm:$0xff] }
  0xf7   : > { %v427_v57 = vpop.f32.mrf.mxu0 }
  0xf8   : > { %v498_v60 = vpop.f32.mrf.mxu1  ;;  %v428_v5 = vadd.f32 %v427_v57, %v345_v3  ;;  %v698_v57 = vld [vmem:[#allocation4 + $0x30] sm:$0xff] }
  0xf9   : > { %v429_v58 = vpop.f32.mrf.mxu0  ;;  %v499_v6 = vadd.f32 %v498_v60, %v353_v4  ;;  %v693_v60 = vld [vmem:[#allocation4 + $0x8] sm:$0xff]  ;;  %v782_v3 = vld [vmem:[#allocation4 + $0x2d0] sm:$0xff]  ;;  %v780_v4 = vld [vmem:[#allocation4 + $0x2c0] sm:$0xff] }
  0xfa   : > { %v430_v59 = vadd.f32 %v429_v58, %v349_v56  ;;  %v1118_v62 = vpop.f32.mrf.mxu1  ;;  %v699_v56 = vld [vmem:[#allocation4 + $0x38] sm:$0xff]  ;;  %v696_v58 = vld [vmem:[#allocation4 + $0x20] sm:$0xff] }
  0xfb   : > { %v786_v62 = vld [vmem:[#allocation4 + $0x2f0] sm:$0xff] }
  0xfc   : > { %v1057_v61 = vmul.f32 -1.442695, %v430_v59  ;;  %v695_v59 = vld [vmem:[#allocation4 + $0x18] sm:$0xff] }
  0xfe   : > { %1152 = vpow2.f32 %v1057_v61  ;;  %v692_v61 = vld [vmem:[#allocation4] sm:$0xff] }
 0x10b   : > { %v1153_v63 = vpop.eup %1152 }
 0x10c   : > { %v505_v0 = vadd.f32 1.0, %v1153_v63  ;;  %v785_v63 = vld [vmem:[#allocation4 + $0x2e8] sm:$0xff] }
 0x10e   : > { %1154 = vrcp.f32 %v505_v0  ;;  %v783_v0 = vld [vmem:[#allocation4 + $0x2d8] sm:$0xff] }
 0x11b   : > { %v1155_v7 = vpop.eup %1154 }
 0x11c   : > { %v508_v8 = vadd.f32 %v1155_v7, %v428_v5  ;;  %v779_v5 = vld [vmem:[#allocation4 + $0x2b8] sm:$0xff]  ;;  %v776_v7 = vld [vmem:[#allocation4 + $0x2a0] sm:$0xff] }
 0x11e   : > { %v509_v9 = vadd.f32 %v508_v8, %v499_v6  ;;  %v777_v6 = vld [vmem:[#allocation4 + $0x2a8] sm:$0xff]  ;;  %v774_v8 = vld [vmem:[#allocation4 + $0x290] sm:$0xff] }
 0x120   : > { %v510_v10 = vmax.f32 %v509_v9, 0.0  ;;  %v773_v9 = vld [vmem:[#allocation4 + $0x288] sm:$0xff] }
 0x122   : > { %608 = vmatmul.mubr.f32.vlgmr.msra.gmra.mxu0 %v510_v10  ;;  %v771_v10 = vld [vmem:[#allocation4 + $0x278] sm:$0xff] }
 0x123   : > { %1070 = vmatpush3.msra.mxu0 %v739_v12  ;;  %v768_v12 = vld [vmem:[#allocation4 + $0x260] sm:$0xff] }
 0x124   : > { %1071 = vmatprep.subr.mxu0 %v784_v13  ;;  %v767_v13 = vld [vmem:[#allocation4 + $0x258] sm:$0xff] }
 0x125   : > { %1072 = vmatpush3.msra.mxu0 %v736_v14  ;;  %v765_v14 = vld [vmem:[#allocation4 + $0x248] sm:$0xff] }
 0x126   : > { %1073 = vmatprep.subr.mxu0 %v781_v15  ;;  %v766_v15 = vld [vmem:[#allocation4 + $0x250] sm:$0xff] }
 0x127   : > { %1074 = vmatpush3.msra.mxu0 %v733_v16  ;;  %v764_v16 = vld [vmem:[#allocation4 + $0x240] sm:$0xff] }
 0x128   : > { %1075 = vmatprep.subr.mxu0 %v778_v17  ;;  %v718_v17 = vld [vmem:[#allocation4 + $0xd0] sm:$0xff] }
 0x129   : > { %1076 = vmatpush3.msra.mxu0 %v730_v18  ;;  %v762_v18 = vld [vmem:[#allocation4 + $0x230] sm:$0xff] }
 0x12a   : > { %1077 = vmatprep.subr.mxu0 %v775_v19  ;;  %v763_v19 = vld [vmem:[#allocation4 + $0x238] sm:$0xff] }
 0x12b   : > { %1078 = vmatpush3.msra.mxu0 %v727_v20  ;;  %v761_v20 = vld [vmem:[#allocation4 + $0x228] sm:$0xff] }
 0x12c   : > { %1079 = vmatprep.subr.mxu0 %v772_v21  ;;  %v715_v21 = vld [vmem:[#allocation4 + $0xb8] sm:$0xff] }
 0x12d   : > { %1080 = vmatpush3.msra.mxu0 %v724_v22  ;;  %v759_v22 = vld [vmem:[#allocation4 + $0x218] sm:$0xff] }
 0x12e   : > { %1081 = vmatprep.subr.mxu0 %v769_v23  ;;  %v760_v23 = vld [vmem:[#allocation4 + $0x220] sm:$0xff] }
 0x12f   : > { %1082 = vmatpush3.msra.mxu0 %v721_v24  ;;  %v758_v24 = vld [vmem:[#allocation4 + $0x210] sm:$0xff] }
 0x130   : > { %1083 = vmatprep.subr.mxu0 %v766_v15 }
 0x131   : > { %1084 = vmatpush3.msra.mxu0 %v718_v17 }
 0x132   : > { %1085 = vmatprep.subr.mxu0 %v763_v19 }
 0x133   : > { %1086 = vmatpush3.msra.mxu0 %v715_v21 }
 0x134   : > { %1087 = vmatprep.subr.mxu0 %v760_v23 }
 0x1e2   : > { %v609_v25 = vpop.f32.mrf.mxu0 }
 0x1e4   : > { %v611_v26 = vpop.f32.mrf.mxu0 }
 0x1e5   : > { %649 = vmatprep.subr.mxu1 %v611_v26  ;;  %v756_v26 = vld [vmem:[#allocation4 + $0x200] sm:$0xff] }
 0x1e6   : > { %650 = vmatpush1.msra.mxu1 %v609_v25  ;;  %v712_v25 = vld [vmem:[#allocation4 + $0xa0] sm:$0xff] }
 0x1e7   : > { %1058 = vmatmul.mubr.msk.f32.vlgmr.msra.gmra.mxu1 %vm615_vm2, %v614_v27  ;;  %805 = vmatprep.subr.mxu1 %v738_v28  ;;  %v757_v27 = vld [vmem:[#allocation4 + $0x208] sm:$0xff]  ;;  %v755_v28 = vld [vmem:[#allocation4 + $0x1f8] sm:$0xff] }
 0x1e8   : > { %806 = vmatpush1.msra.mxu1 %v737_v29  ;;  %1088 = vmatpush3.msra.mxu0 %v712_v25  ;;  %v709_v29 = vld [vmem:[#allocation4 + $0x88] sm:$0xff] }
 0x1e9   : > { %807 = vmatprep.subr.mxu1 %v735_v30  ;;  %v753_v30 = vld [vmem:[#allocation4 + $0x1e8] sm:$0xff]  ;;  %1089 = vmatprep.subr.mxu0 %v757_v27 }
 0x1ea   : > { %808 = vmatpush1.msra.mxu1 %v734_v31  ;;  %v754_v31 = vld [vmem:[#allocation4 + $0x1f0] sm:$0xff]  ;;  %1090 = vmatpush3.msra.mxu0 %v709_v29 }
 0x1eb   : > { %809 = vmatprep.subr.mxu1 %v732_v32  ;;  %v752_v32 = vld [vmem:[#allocation4 + $0x1e0] sm:$0xff]  ;;  %1091 = vmatprep.subr.mxu0 %v754_v31 }
 0x1ec   : > { %810 = vmatpush1.msra.mxu1 %v731_v33  ;;  %v706_v33 = vld [vmem:[#allocation4 + $0x70] sm:$0xff] }
 0x1ed   : > { %811 = vmatprep.subr.mxu1 %v729_v34  ;;  %v750_v34 = vld [vmem:[#allocation4 + $0x1d0] sm:$0xff]  ;;  %1092 = vmatpush3.msra.mxu0 %v706_v33 }
 0x1ee   : > { %812 = vmatpush1.msra.mxu1 %v728_v35  ;;  %v751_v35 = vld [vmem:[#allocation4 + $0x1d8] sm:$0xff] }
 0x1ef   : > { %813 = vmatprep.subr.mxu1 %v726_v36  ;;  %v749_v36 = vld [vmem:[#allocation4 + $0x1c8] sm:$0xff]  ;;  %1093 = vmatprep.subr.mxu0 %v751_v35 }
 0x1f0   : > { %814 = vmatpush1.msra.mxu1 %v725_v37  ;;  %v703_v37 = vld [vmem:[#allocation4 + $0x58] sm:$0xff] }
 0x1f1   : > { %815 = vmatprep.subr.mxu1 %v723_v38  ;;  %v747_v38 = vld [vmem:[#allocation4 + $0x1b8] sm:$0xff]  ;;  %1094 = vmatpush3.msra.mxu0 %v703_v37 }
 0x1f2   : > { %816 = vmatpush1.msra.mxu1 %v722_v39  ;;  %v748_v39 = vld [vmem:[#allocation4 + $0x1c0] sm:$0xff] }
 0x1f3   : > { %817 = vmatprep.subr.mxu1 %v720_v40  ;;  %v746_v40 = vld [vmem:[#allocation4 + $0x1b0] sm:$0xff]  ;;  %1095 = vmatprep.subr.mxu0 %v748_v39 }
 0x1f4   : > { %818 = vmatpush1.msra.mxu1 %v719_v41  ;;  %v700_v41 = vld [vmem:[#allocation4 + $0x40] sm:$0xff] }
 0x1f5   : > { %819 = vmatprep.subr.mxu1 %v717_v42  ;;  %v744_v42 = vld [vmem:[#allocation4 + $0x1a0] sm:$0xff]  ;;  %1096 = vmatpush3.msra.mxu0 %v700_v41 }
 0x1f6   : > { %820 = vmatpush1.msra.mxu1 %v716_v43  ;;  %v745_v43 = vld [vmem:[#allocation4 + $0x1a8] sm:$0xff] }
 0x1f7   : > { %821 = vmatprep.subr.mxu1 %v714_v44  ;;  %v743_v44 = vld [vmem:[#allocation4 + $0x198] sm:$0xff]  ;;  %1097 = vmatprep.subr.mxu0 %v745_v43 }
 0x1f8   : > { %822 = vmatpush1.msra.mxu1 %v713_v45  ;;  %v697_v45 = vld [vmem:[#allocation4 + $0x28] sm:$0xff] }
 0x1f9   : > { %823 = vmatprep.subr.mxu1 %v711_v46  ;;  %v741_v46 = vld [vmem:[#allocation4 + $0x188] sm:$0xff]  ;;  %1098 = vmatpush3.msra.mxu0 %v697_v45 }
 0x1fa   : > { %824 = vmatpush1.msra.mxu1 %v710_v47  ;;  %v742_v47 = vld [vmem:[#allocation4 + $0x190] sm:$0xff] }
 0x1fb   : > { %825 = vmatprep.subr.mxu1 %v708_v48  ;;  %v740_v48 = vld [vmem:[#allocation4 + $0x180] sm:$0xff]  ;;  %1099 = vmatprep.subr.mxu0 %v742_v47 }
 0x1fc   : > { %826 = vmatpush1.msra.mxu1 %v707_v49  ;;  %v694_v49 = vld [vmem:[#allocation4 + $0x10] sm:$0xff] }
 0x1fd   : > { %827 = vmatprep.subr.mxu1 %v705_v50  ;;  %1100 = vmatpush3.msra.mxu0 %v694_v49 }
 0x1fe   : > { %828 = vmatpush1.msra.mxu1 %v704_v51 }
 0x1ff   : > { %829 = vmatprep.subr.mxu1 %v702_v52 }
 0x200   : > { %830 = vmatpush1.msra.mxu1 %v701_v55 }
 0x201   : > { %831 = vmatprep.subr.mxu1 %v699_v56  ;;  %v788_v56 = vld [vmem:[%s1473_s6] sm:$0x7] }
 0x202   : > { %832 = vmatpush1.msra.mxu1 %v698_v57  ;;  %v797_v57 = vrot.slane %v788_v56, %v348_v54 }
 0x203   : > { %833 = vmatprep.subr.mxu1 %v696_v58 }
 0x204   : > { %834 = vmatpush1.msra.mxu1 %v695_v59 }
 0x205   : > { %835 = vmatprep.subr.mxu1 %v693_v60 }
 0x206   : > { %836 = vmatpush1.msra.mxu1 %v692_v61 }
 0x207   : > { %837 = vmatprep.subr.mxu1 %v786_v62 }
 0x208   : > { %838 = vmatpush2.msra.mxu1 %v785_v63 }
 0x209   : > { %839 = vmatprep.subr.mxu1 %v783_v0 }
 0x20a   : > { %840 = vmatpush2.msra.mxu1 %v782_v3 }
 0x20b   : > { %841 = vmatprep.subr.mxu1 %v780_v4  ;;  %v793_v4 = vrot.slane %v788_v56, %v344_v1 }
 0x20c   : > { %842 = vmatpush2.msra.mxu1 %v779_v5  ;;  %v801_v5 = vrot.slane %v788_v56, %v352_v2 }
 0x20d   : > { %843 = vmatprep.subr.mxu1 %v777_v6 }
 0x20e   : > { %844 = vmatpush2.msra.mxu1 %v776_v7 }
 0x20f   : > { %845 = vmatprep.subr.mxu1 %v774_v8 }
 0x210   : > { %846 = vmatpush2.msra.mxu1 %v773_v9 }
 0x211   : > { %847 = vmatprep.subr.mxu1 %v771_v10 }
 0x212   : > { %848 = vmatpush2.msra.mxu1 %v770_v11 }
 0x213   : > { %849 = vmatprep.subr.mxu1 %v768_v12 }
 0x214   : > { %850 = vmatpush2.msra.mxu1 %v767_v13 }
 0x215   : > { %851 = vmatprep.subr.mxu1 %v765_v14 }
 0x216   : > { %852 = vmatpush2.msra.mxu1 %v764_v16 }
 0x217   : > { %853 = vmatprep.subr.mxu1 %v762_v18 }
 0x218   : > { %854 = vmatpush2.msra.mxu1 %v761_v20 }
 0x219   : > { %855 = vmatprep.subr.mxu1 %v759_v22 }
 0x21a   : > { %856 = vmatpush2.msra.mxu1 %v758_v24 }
 0x21b   : > { %857 = vmatprep.subr.mxu1 %v756_v26 }
 0x21c   : > { %858 = vmatpush2.msra.mxu1 %v755_v28 }
 0x21d   : > { %859 = vmatprep.subr.mxu1 %v753_v30 }
 0x21e   : > { %860 = vmatpush2.msra.mxu1 %v752_v32 }
 0x21f   : > { %861 = vmatprep.subr.mxu1 %v750_v34 }
 0x220   : > { %862 = vmatpush2.msra.mxu1 %v749_v36 }
 0x221   : > { %863 = vmatprep.subr.mxu1 %v747_v38 }
 0x222   : > { %864 = vmatpush2.msra.mxu1 %v746_v40 }
 0x223   : > { %865 = vmatprep.subr.mxu1 %v744_v42 }
 0x224   : > { %866 = vmatpush2.msra.mxu1 %v743_v44 }
 0x225   : > { %867 = vmatprep.subr.mxu1 %v741_v46 }
 0x226   : > { %868 = vmatpush2.msra.mxu1 %v740_v48 }
 0x2a7   : > { %v685_v50 = vpop.f32.mrf.mxu1 }
 0x2a9   : > { %v687_v51 = vpop.f32.mrf.mxu1 }
 0x2aa   : > { %1156 = vtanh.f32 %v687_v51 }
 0x2ab   : > { %1158 = vtanh.f32 %v685_v50 }
 0x2b7   : > { %v1157_v52 = vpop.eup %1156 }
 0x2b8   : > { %v1159_v55 = vpop.eup %1158  ;;  %869 = vmatprep.mubr.f32.mxu1 %v1157_v52  ;;  %940 = vmatprep.mubr.f32.mxu0 %v1157_v52 }
 0x2b9   : > { %870 = vmatmul.mubr.f32.vlgmr.msra.gmra.mxu1 %v1159_v55  ;;  %941 = vmatmul.mubr.f32.vlgmr.msra.gmra.mxu0 %v1159_v55 }
 0x379   : > { %v871_v58 = vpop.f32.mrf.mxu1  ;;  %v1101_v0 = vpop.f32.mrf.mxu0 }
 0x37a   : > { %v872_v7 = vadd.f32 %v871_v58, %v793_v4 }
 0x37b   : > { %v873_v59 = vpop.f32.mrf.mxu1  ;;  %v1102_v3 = vpop.f32.mrf.mxu0 }
 0x37c   : > { %v874_v60 = vadd.f32 %v873_v59, %v797_v57  ;;  %v1103_v6 = vadd.f32 %v1102_v3, %v1101_v0 }
 0x37e   : > { %v1059_v61 = vmul.f32 -1.442695, %v874_v60  ;;  %v943_v8 = vadd.f32 %v1103_v6, %v801_v5 }
 0x380   : > { %1160 = vpow2.f32 %v1059_v61 }
 0x38d   : > { %v1161_v62 = vpop.eup %1160 }
 0x38e   : > { %v949_v63 = vadd.f32 1.0, %v1161_v62 }
 0x390   : > { %1162 = vrcp.f32 %v949_v63 }
 0x39d   : > { %v1163_v54 = vpop.eup %1162 }
 0x39e   : > { %v952_v9 = vadd.f32 %v1163_v54, %v872_v7 }
 0x3a0   : > { %v953_v10 = vadd.f32 %v952_v9, %v943_v8 }
 0x3a2   : > { %v954_v11 = vmax.f32 %v953_v10, 0.0 }
 0x3a4   : > { %955 = vst [vmem:[%s320_s9] sm:$0xff] %v954_v11 }
 0x3a5 PF: > { %s19_s24 = sadd.s32 1, %s1230_s24  }
 0x3a6   : > { %p16_p3 = scmp.ge.s32.totalorder %s19_s24, 4  }
 0x3a8   :  { %18 = sbr.rel (!%p16_p3) target bundleno = 2 (0x2), region = 90 }
 0x3ad   :  { %975 = vsyncpa [#allocation3], 1 }
 0x3ae   :  { %977 = vsyncpa [#allocation3 + $0x1], 1 }
 0x3af   :  { %978 = vsyncpa [#allocation5], 1 }

</bundles_post_ra>
